<compile_context>
chip_gen: v7x
topology: tpu7x:2x2x1
jax: 0.10.0
libtpu: 0.0.40
codegen_flags: <defaults>
</compile_context>

<pallas_src>
import jax
import jax.numpy as jnp
from jax.experimental import pallas as pl
from jax.experimental.pallas import tpu as pltpu

IN_FEATURES = 412   # raw observation width (fc1 contraction dim, unpadded)
H1, H2, H3 = 256, 128, 64
HEAD_OUT = 412      # policy logits width
HEAD_PAD = 512      # fused head width: [policy 412 | value 1 | zeros 99]
MAX_TILE_B = 1024   # largest batch tile; ~8.5 MB worst-case VMEM footprint


def _round_up(x, m):
    return (x + m - 1) // m * m


def _policy_net_kernel(x_ref,
                       w1_ref, b1_ref,
                       w2_ref, b2_ref,
                       w3_ref, b3_ref,
                       wh_ref, bh_ref,
                       out_ref):
    """Fused MLP 412 -> 256 -> 128 -> 64 -> 512 (policy | value | zero-pad).

    x arrives already bf16; weights are bf16; every dot accumulates in f32 on
    the MXU; bias-add and ReLU stay f32 on the VPU.
    """
    # fc1 + relu (x already bf16 -- no in-kernel cast for the first layer)
    h = jnp.maximum(
        jnp.dot(x_ref[...], w1_ref[...], preferred_element_type=jnp.float32)
        + b1_ref[...], 0.0)
    # fc2 + relu
    h = jnp.maximum(
        jnp.dot(h.astype(jnp.bfloat16), w2_ref[...],
                preferred_element_type=jnp.float32) + b2_ref[...], 0.0)
    # fc3 + relu
    h = jnp.maximum(
        jnp.dot(h.astype(jnp.bfloat16), w3_ref[...],
                preferred_element_type=jnp.float32) + b3_ref[...], 0.0)
    # Single lane-dense fused head matmul (policy | value), unmasked store.
    out_ref[...] = (
        jnp.dot(h.astype(jnp.bfloat16), wh_ref[...],
                preferred_element_type=jnp.float32) + bh_ref[...]
    ).astype(out_ref.dtype)


def prepare_params(params):
    """Fuse / cast the (in, out)-layout f32 params into kernel form."""
    # Fused head: [policy(412) | value(1) | zeros(99)].
    wh = jnp.zeros((H3, HEAD_PAD), jnp.float32)
    wh = wh.at[:, :HEAD_OUT].set(params["wp"])
    wh = wh.at[:, HEAD_OUT:HEAD_OUT + 1].set(params["wv"])
    bh = jnp.zeros((1, HEAD_PAD), jnp.float32)
    bh = bh.at[:, :HEAD_OUT].set(params["bp"])
    bh = bh.at[:, HEAD_OUT:HEAD_OUT + 1].set(params["bv"])
    return {
        "w1": params["w1"].astype(jnp.bfloat16), "b1": params["b1"],
        "w2": params["w2"].astype(jnp.bfloat16), "b2": params["b2"],
        "w3": params["w3"].astype(jnp.bfloat16), "b3": params["b3"],
        "wh": wh.astype(jnp.bfloat16), "bh": bh,
    }


@jax.jit
def policy_network_forward(x, prep):
    """x: (B, 412) f32. Returns (policy_logits (B, 412), value (B, 1))."""
    B = x.shape[0]
    # Balanced tiles: padding is at most num_tiles*8 rows (B=257 -> 264, not 512).
    num_tiles = pl.cdiv(B, MAX_TILE_B)
    tile_b = _round_up(pl.cdiv(B, num_tiles), 8)
    b_pad = tile_b * num_tiles
    grid = (num_tiles,)

    # Single pad+cast pass: bf16 input halves the streamed x bytes; the zero
    # rows are exact (each output row depends only on its own input row).
    x_b = x.astype(jnp.bfloat16)
    if b_pad != B:
        x_b = jnp.pad(x_b, ((0, b_pad - B), (0, 0)))

    def resident(shape):  # weights/biases: constant index_map, stay in VMEM
        return pl.BlockSpec(shape, lambda i: (0, 0))

    flops = 2 * b_pad * (IN_FEATURES * H1 + H1 * H2 + H2 * H3 + H3 * HEAD_PAD)
    weight_bytes = 2 * (IN_FEATURES * H1 + H1 * H2 + H2 * H3 + H3 * HEAD_PAD)
    bias_bytes = 4 * (H1 + H2 + H3 + HEAD_PAD)
    io_bytes = 2 * b_pad * IN_FEATURES + 4 * b_pad * HEAD_PAD

    out = pl.pallas_call(
        _policy_net_kernel,
        out_shape=jax.ShapeDtypeStruct((b_pad, HEAD_PAD), jnp.float32),
        grid=grid,
        in_specs=[
            # x tile: full-extent 412 lane dim (legal; == full array dim)
            pl.BlockSpec((tile_b, IN_FEATURES), lambda i: (i, 0)),
            resident((IN_FEATURES, H1)), resident((1, H1)),
            resident((H1, H2)), resident((1, H2)),
            resident((H2, H3)), resident((1, H3)),
            resident((H3, HEAD_PAD)), resident((1, HEAD_PAD)),
        ],
        out_specs=pl.BlockSpec((tile_b, HEAD_PAD), lambda i: (i, 0)),
        compiler_params=pltpu.CompilerParams(
            dimension_semantics=("parallel",)),   # shards across v7x's 2 TCs
        cost_estimate=pl.CostEstimate(
            flops=flops, transcendentals=0,
            bytes_accessed=weight_bytes + bias_bytes + io_bytes),
    )(x_b,
      prep["w1"], prep["b1"],
      prep["w2"], prep["b2"],
      prep["w3"], prep["b3"],
      prep["wh"], prep["bh"])

    policy_logits = out[:B, :HEAD_OUT]
    value = out[:B, HEAD_OUT:HEAD_OUT + 1]
    return policy_logits, value
    # TODO(synk): for steady-state B=8 serving, keep the ~350 KB bf16 weights
    # resident across calls (cross-pallas_call VMEM/semaphore futures, P10) or
    # aggregate requests into one batched call; per-call weight DMA + launch
    # overhead dominates at B=8.


def init_params(key):
    """Deterministic init mimicking nn.Linear's U(-1/sqrt(fan_in), 1/sqrt(fan_in)).
    Weights stored as (in_features, out_features) f32."""
    dims = [("w1", "b1", IN_FEATURES, H1),
            ("w2", "b2", H1, H2),
            ("w3", "b3", H2, H3),
            ("wp", "bp", H3, HEAD_OUT),
            ("wv", "bv", H3, 1)]
    params = {}
    for wname, bname, fan_in, fan_out in dims:
        key, kw, kb = jax.random.split(key, 3)
        bound = 1.0 / jnp.sqrt(jnp.float32(fan_in))
        params[wname] = jax.random.uniform(
            kw, (fan_in, fan_out), jnp.float32, minval=-bound, maxval=bound)
        params[bname] = jax.random.uniform(
            kb, (1, fan_out), jnp.float32, minval=-bound, maxval=bound)
    return params


def _reference_forward(x, params):
    """Pure-JAX reference with the same bf16 weight/activation quantization."""
    def dense(h, w, b):
        return jnp.dot(h.astype(jnp.bfloat16), w.astype(jnp.bfloat16),
                       preferred_element_type=jnp.float32) + b
    h = jnp.maximum(dense(x, params["w1"], params["b1"]), 0.0)
    h = jnp.maximum(dense(h, params["w2"], params["b2"]), 0.0)
    h = jnp.maximum(dense(h, params["w3"], params["b3"]), 0.0)
    return (dense(h, params["wp"], params["bp"]),
            dense(h, params["wv"], params["bv"]))


if __name__ == "__main__":
    key = jax.random.PRNGKey(0)
    key, kx = jax.random.split(key)

    params = init_params(key)
    prep = prepare_params(params)

    # B=8: single-step grid (typical serving batch).
    B = 8
    x = jax.random.normal(kx, (B, IN_FEATURES), jnp.float32)
    policy_logits, value = policy_network_forward(x, prep)
    jax.block_until_ready((policy_logits, value))

    ref_policy, ref_value = _reference_forward(x, params)
    assert policy_logits.shape == (B, HEAD_OUT)
    assert value.shape == (B, 1)
    assert jnp.allclose(policy_logits, ref_policy, atol=2e-3, rtol=2e-3)
    assert jnp.allclose(value, ref_value, atol=2e-3, rtol=2e-3)

    # B=11: exercises the batch-pad (partial-tile-rounding) path.
    key, kx2 = jax.random.split(key)
    B2 = 11
    x2 = jax.random.normal(kx2, (B2, IN_FEATURES), jnp.float32)
    p2, v2 = policy_network_forward(x2, prep)
    jax.block_until_ready((p2, v2))
    rp2, rv2 = _reference_forward(x2, params)
    assert p2.shape == (B2, HEAD_OUT) and v2.shape == (B2, 1)
    assert jnp.allclose(p2, rp2, atol=2e-3, rtol=2e-3)
    assert jnp.allclose(v2, rv2, atol=2e-3, rtol=2e-3)

    print("KERNEL_OK")
</pallas_src>

<mosaic_0001>
module attributes {stable_mosaic.version = 11 : i64} {
  func.func @_policy_net_kernel(%arg0: i32, %arg1: memref<8x412xbf16, #tpu.memory_space<vmem>>, %arg2: memref<412x256xbf16, #tpu.memory_space<vmem>>, %arg3: memref<1x256xf32, #tpu.memory_space<vmem>>, %arg4: memref<256x128xbf16, #tpu.memory_space<vmem>>, %arg5: memref<1x128xf32, #tpu.memory_space<vmem>>, %arg6: memref<128x64xbf16, #tpu.memory_space<vmem>>, %arg7: memref<1x64xf32, #tpu.memory_space<vmem>>, %arg8: memref<64x512xbf16, #tpu.memory_space<vmem>>, %arg9: memref<1x512xf32, #tpu.memory_space<vmem>>, %arg10: memref<8x512xf32, #tpu.memory_space<vmem>>) attributes {dimension_semantics = [#tpu.dimension_semantics<parallel>], iteration_bounds = array<i64: 1>, scalar_prefetch = 0 : i64, scratch_operands = 0 : i64, tpu.core_type = #tpu.core_type<tc>, window_params = [{transform_indices = @transform_0, window_bounds = array<i64: 8, 412>}, {pipeline_mode = #tpu.pipeline_mode<synchronous>, transform_indices = @transform_1, window_bounds = array<i64: 412, 256>}, {pipeline_mode = #tpu.pipeline_mode<synchronous>, transform_indices = @transform_2, window_bounds = array<i64: 1, 256>}, {pipeline_mode = #tpu.pipeline_mode<synchronous>, transform_indices = @transform_3, window_bounds = array<i64: 256, 128>}, {pipeline_mode = #tpu.pipeline_mode<synchronous>, transform_indices = @transform_4, window_bounds = array<i64: 1, 128>}, {pipeline_mode = #tpu.pipeline_mode<synchronous>, transform_indices = @transform_5, window_bounds = array<i64: 128, 64>}, {pipeline_mode = #tpu.pipeline_mode<synchronous>, transform_indices = @transform_6, window_bounds = array<i64: 1, 64>}, {pipeline_mode = #tpu.pipeline_mode<synchronous>, transform_indices = @transform_7, window_bounds = array<i64: 64, 512>}, {pipeline_mode = #tpu.pipeline_mode<synchronous>, transform_indices = @transform_8, window_bounds = array<i64: 1, 512>}, {transform_indices = @transform_9, window_bounds = array<i64: 8, 512>}]} {
    %c0 = arith.constant 0 : index
    %c0_0 = arith.constant 0 : index
    %0 = vector.load %arg1[%c0, %c0_0] : memref<8x412xbf16, #tpu.memory_space<vmem>>, vector<8x412xbf16>
    %c0_1 = arith.constant 0 : index
    %c0_2 = arith.constant 0 : index
    %1 = vector.load %arg2[%c0_1, %c0_2] : memref<412x256xbf16, #tpu.memory_space<vmem>>, vector<412x256xbf16>
    %cst = arith.constant dense<0.000000e+00> : vector<8x256xf32>
    %2 = tpu.matmul %0, %1, %cst {dimension_numbers = #tpu.dot_dimension_numbers<[1], [0], [0], [1], [0, 0, 1, 1], [], []>} : vector<8x412xbf16>, vector<412x256xbf16>, vector<8x256xf32> -> vector<8x256xf32>
    %c0_3 = arith.constant 0 : index
    %c0_4 = arith.constant 0 : index
    %3 = vector.load %arg3[%c0_3, %c0_4] : memref<1x256xf32, #tpu.memory_space<vmem>>, vector<1x256xf32>
    %4 = vector.broadcast %3 : vector<1x256xf32> to vector<8x256xf32>
    %5 = arith.addf %2, %4 : vector<8x256xf32>
    %cst_5 = arith.constant 0.000000e+00 : f32
    %6 = vector.broadcast %cst_5 : f32 to vector<8x256xf32>
    %7 = arith.maximumf %5, %6 : vector<8x256xf32>
    %8 = arith.truncf %7 : vector<8x256xf32> to vector<8x256xbf16>
    %c0_6 = arith.constant 0 : index
    %c0_7 = arith.constant 0 : index
    %9 = vector.load %arg4[%c0_6, %c0_7] : memref<256x128xbf16, #tpu.memory_space<vmem>>, vector<256x128xbf16>
    %cst_8 = arith.constant dense<0.000000e+00> : vector<8x128xf32>
    %10 = tpu.matmul %8, %9, %cst_8 {dimension_numbers = #tpu.dot_dimension_numbers<[1], [0], [0], [1], [0, 0, 1, 1], [], []>} : vector<8x256xbf16>, vector<256x128xbf16>, vector<8x128xf32> -> vector<8x128xf32>
    %c0_9 = arith.constant 0 : index
    %c0_10 = arith.constant 0 : index
    %11 = vector.load %arg5[%c0_9, %c0_10] : memref<1x128xf32, #tpu.memory_space<vmem>>, vector<1x128xf32>
    %12 = vector.broadcast %11 : vector<1x128xf32> to vector<8x128xf32>
    %13 = arith.addf %10, %12 : vector<8x128xf32>
    %cst_11 = arith.constant 0.000000e+00 : f32
    %14 = vector.broadcast %cst_11 : f32 to vector<8x128xf32>
    %15 = arith.maximumf %13, %14 : vector<8x128xf32>
    %16 = arith.truncf %15 : vector<8x128xf32> to vector<8x128xbf16>
    %c0_12 = arith.constant 0 : index
    %c0_13 = arith.constant 0 : index
    %17 = vector.load %arg6[%c0_12, %c0_13] : memref<128x64xbf16, #tpu.memory_space<vmem>>, vector<128x64xbf16>
    %cst_14 = arith.constant dense<0.000000e+00> : vector<8x64xf32>
    %18 = tpu.matmul %16, %17, %cst_14 {dimension_numbers = #tpu.dot_dimension_numbers<[1], [0], [0], [1], [0, 0, 1, 1], [], []>} : vector<8x128xbf16>, vector<128x64xbf16>, vector<8x64xf32> -> vector<8x64xf32>
    %c0_15 = arith.constant 0 : index
    %c0_16 = arith.constant 0 : index
    %19 = vector.load %arg7[%c0_15, %c0_16] : memref<1x64xf32, #tpu.memory_space<vmem>>, vector<1x64xf32>
    %20 = vector.broadcast %19 : vector<1x64xf32> to vector<8x64xf32>
    %21 = arith.addf %18, %20 : vector<8x64xf32>
    %cst_17 = arith.constant 0.000000e+00 : f32
    %22 = vector.broadcast %cst_17 : f32 to vector<8x64xf32>
    %23 = arith.maximumf %21, %22 : vector<8x64xf32>
    %24 = arith.truncf %23 : vector<8x64xf32> to vector<8x64xbf16>
    %c0_18 = arith.constant 0 : index
    %c0_19 = arith.constant 0 : index
    %25 = vector.load %arg8[%c0_18, %c0_19] : memref<64x512xbf16, #tpu.memory_space<vmem>>, vector<64x512xbf16>
    %cst_20 = arith.constant dense<0.000000e+00> : vector<8x512xf32>
    %26 = tpu.matmul %24, %25, %cst_20 {dimension_numbers = #tpu.dot_dimension_numbers<[1], [0], [0], [1], [0, 0, 1, 1], [], []>} : vector<8x64xbf16>, vector<64x512xbf16>, vector<8x512xf32> -> vector<8x512xf32>
    %c0_21 = arith.constant 0 : index
    %c0_22 = arith.constant 0 : index
    %27 = vector.load %arg9[%c0_21, %c0_22] : memref<1x512xf32, #tpu.memory_space<vmem>>, vector<1x512xf32>
    %28 = vector.broadcast %27 : vector<1x512xf32> to vector<8x512xf32>
    %29 = arith.addf %26, %28 : vector<8x512xf32>
    %c0_23 = arith.constant 0 : index
    %c0_24 = arith.constant 0 : index
    %30 = vector.load %arg10[%c0_23, %c0_24] : memref<8x512xf32, #tpu.memory_space<vmem>>, vector<8x512xf32>
    tpu.vector_store %arg10[%c0_23, %c0_24], %29 {strides = array<i32>} : memref<8x512xf32, #tpu.memory_space<vmem>>, vector<8x512xf32>,
    return
  }
  func.func @transform_0(%arg0: i32) -> (i32, i32) {
    %c0_i32 = arith.constant 0 : i32
    %c0_i32_0 = arith.constant 0 : i32
    return %arg0, %c0_i32 : i32, i32
  }
  func.func @transform_1(%arg0: i32) -> (i32, i32) {
    %c0_i32 = arith.constant 0 : i32
    %c0_i32_0 = arith.constant 0 : i32
    %c0_i32_1 = arith.constant 0 : i32
    return %c0_i32, %c0_i32_0 : i32, i32
  }
  func.func @transform_2(%arg0: i32) -> (i32, i32) {
    %c0_i32 = arith.constant 0 : i32
    %c0_i32_0 = arith.constant 0 : i32
    %c0_i32_1 = arith.constant 0 : i32
    return %c0_i32, %c0_i32_0 : i32, i32
  }
  func.func @transform_3(%arg0: i32) -> (i32, i32) {
    %c0_i32 = arith.constant 0 : i32
    %c0_i32_0 = arith.constant 0 : i32
    %c0_i32_1 = arith.constant 0 : i32
    return %c0_i32, %c0_i32_0 : i32, i32
  }
  func.func @transform_4(%arg0: i32) -> (i32, i32) {
    %c0_i32 = arith.constant 0 : i32
    %c0_i32_0 = arith.constant 0 : i32
    %c0_i32_1 = arith.constant 0 : i32
    return %c0_i32, %c0_i32_0 : i32, i32
  }
  func.func @transform_5(%arg0: i32) -> (i32, i32) {
    %c0_i32 = arith.constant 0 : i32
    %c0_i32_0 = arith.constant 0 : i32
    %c0_i32_1 = arith.constant 0 : i32
    return %c0_i32, %c0_i32_0 : i32, i32
  }
  func.func @transform_6(%arg0: i32) -> (i32, i32) {
    %c0_i32 = arith.constant 0 : i32
    %c0_i32_0 = arith.constant 0 : i32
    %c0_i32_1 = arith.constant 0 : i32
    return %c0_i32, %c0_i32_0 : i32, i32
  }
  func.func @transform_7(%arg0: i32) -> (i32, i32) {
    %c0_i32 = arith.constant 0 : i32
    %c0_i32_0 = arith.constant 0 : i32
    %c0_i32_1 = arith.constant 0 : i32
    return %c0_i32, %c0_i32_0 : i32, i32
  }
  func.func @transform_8(%arg0: i32) -> (i32, i32) {
    %c0_i32 = arith.constant 0 : i32
    %c0_i32_0 = arith.constant 0 : i32
    %c0_i32_1 = arith.constant 0 : i32
    return %c0_i32, %c0_i32_0 : i32, i32
  }
  func.func @transform_9(%arg0: i32) -> (i32, i32) {
    %c0_i32 = arith.constant 0 : i32
    %c0_i32_0 = arith.constant 0 : i32
    return %arg0, %c0_i32 : i32, i32
  }
}

</mosaic_0001>

<bundles_post_ra>
// kernel: policy_network_forward.1
= control target key start
LH: loop header
LB: loop body
LE: loop exit
PB: predicated region body
PF: predicated region fallthrough
CT: control target
= control target key end

     0   :  { %14 = vsyncpa [#allocation3], 0  ;;  %s1552_s0 = inlined_call_operand.vmem [shape: bf16[8,412], index: 0, kind: input, shape index: {}]   ;;  %s1553_s1 = inlined_call_operand.hbm [shape: bf16[412,256], index: 1, kind: input, shape index: {}]   ;;  %s1554_s2 = inlined_call_operand.vmem [shape: f32[1,256], index: 2, kind: input, shape index: {}]   ;;  %s1555_s3 = inlined_call_operand.vmem [shape: bf16[256,128], index: 3, kind: input, shape index: {}]   ;;  %s1556_s4 = inlined_call_operand.vmem [shape: f32[1,128], index: 4, kind: input, shape index: {}]   ;;  %s1557_s5 = inlined_call_operand.vmem [shape: bf16[128,64], index: 5, kind: input, shape index: {}]   ;;  %s1558_s6 = inlined_call_operand.vmem [shape: f32[1,64], index: 6, kind: input, shape index: {}]   ;;  %s1559_s7 = inlined_call_operand.hbm [shape: bf16[64,512], index: 7, kind: input, shape index: {}]   ;;  %s1560_s8 = inlined_call_operand.vmem [shape: f32[1,512], index: 8, kind: input, shape index: {}]   ;;  %s1561_s9 = inlined_call_operand.vmem [shape: f32[8,512], index: 9, kind: output, shape index: {}]  }
   0x1   :  { %15 = vsyncpa [#allocation5], 0  ;;  %s1345_s30 = smov [#allocation2]   ;;  %s1297_s13 = scalar_lea.hbm %s1553_s1, 6656 }
   0x2   :  { %s23_s10 = sshll.u32 %s1345_s30, 4  ;;  %p1298_p0 = scmp.ne.s32.totalorder %s1553_s1, %s1297_s13  ;;  %s24_s10 = int_to_ptr.vmem [resolvable:$true] %s23_s10 }
   0x3   :  { %p1301_p1 = scmp.lt.u32.totalorder %s1297_s13, %s1553_s1 }
   0x5   :  { %p1303_p2 = pnand %p1301_p1, %p1298_p0 }
   0x7   :  { %1306 = shalt.err (!%p1303_p2)
}
   0x8   :  { %s1307_s18 = scalar_lea.vmem %s24_s10, 6656  ;;  %p1312_p4 = scmp.lt.s32.totalorder %s24_s10, %s24_s10 }
   0x9   :  { %p1308_p3 = scmp.ne.s32.totalorder %s24_s10, %s1307_s18  ;;  %p1313_p5 = scmp.lt.s32.totalorder %s1307_s18, %s1307_s18 }
   0xb   :  { %p1314_p6 = por %p1313_p5, %p1312_p4 }
   0xd   :  { %p1315_p7 = pnand %p1314_p6, %p1308_p3 }
   0xf   :  { %1318 = shalt.err (!%p1315_p7)
}
  0x10   :  { %s1346_s19 = smov 128   ;;  %s1347_s20 = smov 8  }
  0x11   :  { %29 = dma.hbm_to_vmem [thread:$0]  %s1553_s1, 6656, %s24_s10, [#allocation3], %s1346_s19, %s1346_s19, %s1347_s20  }
  0x12   :  { %s1348_s23 = smov [#allocation4]   ;;  %s1319_s27 = scalar_lea.hbm %s1559_s7, 2048 }
  0x13   :  { %s45_s24 = sshll.u32 %s1348_s23, 4  ;;  %p1320_p8 = scmp.ne.s32.totalorder %s1559_s7, %s1319_s27  ;;  %s46_s24 = int_to_ptr.vmem [resolvable:$true] %s45_s24 }
  0x14   :  { %p1323_p9 = scmp.lt.u32.totalorder %s1319_s27, %s1559_s7 }
  0x16   :  { %p1325_p10 = pnand %p1323_p9, %p1320_p8 }
  0x18   :  { %1328 = shalt.err (!%p1325_p10)
}
  0x19   :  { %s1329_s12 = scalar_lea.vmem %s46_s24, 2048  ;;  %p1334_p12 = scmp.lt.s32.totalorder %s46_s24, %s46_s24 }
  0x1a   :  { %p1330_p11 = scmp.ne.s32.totalorder %s46_s24, %s1329_s12  ;;  %p1335_p13 = scmp.lt.s32.totalorder %s1329_s12, %s1329_s12 }
  0x1c   :  { %p1336_p0 = por %p1335_p13, %p1334_p12 }
  0x1e   :  { %p1337_p1 = pnand %p1336_p0, %p1330_p11 }
  0x20   :  { %1340 = shalt.err (!%p1337_p1)
}
  0x21   :  { %s1349_s1 = smov 256   ;;  %s1350_s10 = smov 16  }
  0x22   :  { %51 = dma.hbm_to_vmem [thread:$0]  %s1559_s7, 2048, %s46_s24, [#allocation5], %s1349_s1, %s1349_s1, %s1350_s10  }
  0x23   :  { %1341 = dma.done.wait [#allocation3], 6656  }
  0x24   :  { %1342 = vsyncadd [#allocation3], 4294960640 }
  0x25   :  { %1343 = dma.done.wait [#allocation5], 2048  }
  0x26   :  { %1344 = vsyncadd [#allocation5], 4294965248  ;;  %v1167_v0 = vld [vmem:[#allocation2 + $0x4] ss:$8 sps:$4 sm:$0xff]   ;;  %v1169_v1 = vld [vmem:[#allocation2] ss:$8 sps:$4 sm:$0xff]  }
  0x27   :  { %409 = vmatprep.subr.bf16.mxu0 %v1167_v0  ;;  %v1170_v2 = vld [vmem:[#allocation2 + $0x14] ss:$8 sps:$4 sm:$0xff]   ;;  %v1172_v3 = vld [vmem:[#allocation2 + $0x10] ss:$8 sps:$4 sm:$0xff]   ;;  %v1173_v4 = vld [vmem:[#allocation2 + $0x24] ss:$8 sps:$4 sm:$0xff]  }
  0x28   :  { %410 = vmatpush1.bf16.msra.mxu0 %v1169_v1  ;;  %v1175_v5 = vld [vmem:[#allocation2 + $0x20] ss:$8 sps:$4 sm:$0xff]   ;;  %v1176_v6 = vld [vmem:[#allocation2 + $0x34] ss:$8 sps:$4 sm:$0xff]   ;;  %v1178_v7 = vld [vmem:[#allocation2 + $0x30] ss:$8 sps:$4 sm:$0xff]  }
  0x29   :  { %411 = vmatprep.subr.bf16.mxu0 %v1170_v2  ;;  %v1179_v8 = vld [vmem:[#allocation2 + $0x44] ss:$8 sps:$4 sm:$0xff]   ;;  %v1181_v9 = vld [vmem:[#allocation2 + $0x40] ss:$8 sps:$4 sm:$0xff]   ;;  %v1182_v10 = vld [vmem:[#allocation2 + $0x54] ss:$8 sps:$4 sm:$0xff]  }
  0x2a   :  { %v1184_v11 = vld [vmem:[#allocation2 + $0x50] ss:$8 sps:$4 sm:$0xff]   ;;  %v1185_v12 = vld [vmem:[#allocation2 + $0x64] ss:$8 sps:$4 sm:$0xff]   ;;  %v1187_v15 = vld [vmem:[#allocation2 + $0x60] ss:$8 sps:$4 sm:$0xff]  }
  0x2b   :  { %v1431_v13 = vld [vmem:[%s1552_s0] sm:$0xff]  ;;  %v1188_v16 = vld [vmem:[#allocation2 + $0x74] ss:$8 sps:$4 sm:$0xff]   ;;  %v1190_v17 = vld [vmem:[#allocation2 + $0x70] ss:$8 sps:$4 sm:$0xff]   ;;  %vm398_vm0 = vcmask 228352  }
  0x2c   :  { %412 = vmatpush1.bf16.msra.mxu0 %v1172_v3  ;;  %v1000_v14 = vcombine.high %v1431_v13, %v1431_v13  ;;  %v1191_v18 = vld [vmem:[#allocation2 + $0x84] ss:$8 sps:$4 sm:$0xff]   ;;  %v1193_v19 = vld [vmem:[#allocation2 + $0x80] ss:$8 sps:$4 sm:$0xff]   ;;  %v1194_v20 = vld [vmem:[#allocation2 + $0x94] ss:$8 sps:$4 sm:$0xff]   ;;  %v999_v48 = vcombine.low %v1431_v13, %v1431_v13 }
  0x2d   :  { %413 = vmatprep.subr.bf16.mxu0 %v1173_v4  ;;  %v1196_v21 = vld [vmem:[#allocation2 + $0x90] ss:$8 sps:$4 sm:$0xff]   ;;  %v1197_v22 = vld [vmem:[#allocation2 + $0xa4] ss:$8 sps:$4 sm:$0xff]   ;;  %v1199_v24 = vld [vmem:[#allocation2 + $0xa0] ss:$8 sps:$4 sm:$0xff]  }
  0x2e   :  { %441 = vmatprep.mubr.bf16.mxu0 %v1000_v14  ;;  %v1249_v23 = vld [vmem:[%s1555_s3 + $0x40] sm:$0xff]   ;;  %v1200_v26 = vld [vmem:[#allocation2 + $0xb4] ss:$8 sps:$4 sm:$0xff]   ;;  %v1251_v27 = vld [vmem:[%s1555_s3 + $0x48] sm:$0xff]   ;;  %vm402_vm1 = vcmask 1045504   ;;  %vm1352_vm2 = vmmov 0  }
  0x2f   :  { %1101 = vmatprep.subr.bf16.mxu1 %v1249_v23  ;;  %v1250_v25 = vld [vmem:[%s1555_s3] sm:$0xff]   ;;  %v1252_v28 = vld [vmem:[%s1555_s3 + $0x8] sm:$0xff]   ;;  %v1253_v29 = vld [vmem:[%s1555_s3 + $0x50] sm:$0xff]   ;;  %vm903_vm3 = vcmask 523264  }
  0x30   :  { %414 = vmatpush1.bf16.msra.mxu0 %v1175_v5  ;;  %1102 = vmatpush3.bf16.msra.mxu1 %v1250_v25  ;;  %v1202_v30 = vld [vmem:[#allocation2 + $0xb0] ss:$8 sps:$4 sm:$0xff]   ;;  %v1203_v31 = vld [vmem:[#allocation2 + $0xc4] ss:$8 sps:$4 sm:$0xff]   ;;  %v1205_v34 = vld [vmem:[#allocation2 + $0xc0] ss:$8 sps:$4 sm:$0xff]  }
  0x31   :  { %415 = vmatprep.subr.bf16.mxu0 %v1176_v6  ;;  %1103 = vmatprep.subr.bf16.mxu1 %v1251_v27  ;;  %v1254_v32 = vld [vmem:[%s1555_s3 + $0x10] sm:$0xff]   ;;  %v1255_v33 = vld [vmem:[%s1555_s3 + $0x58] sm:$0xff]   ;;  %v1257_v37 = vld [vmem:[%s1555_s3 + $0x60] sm:$0xff]  }
  0x32   :  { %v1206_v35 = vld [vmem:[#allocation2 + $0xd4] ss:$8 sps:$4 sm:$0xff]   ;;  %v1208_v38 = vld [vmem:[#allocation2 + $0xd0] ss:$8 sps:$4 sm:$0xff]   ;;  %v1258_v39 = vld [vmem:[%s1555_s3 + $0x20] sm:$0xff]  }
  0x33   :  { %v1256_v36 = vld [vmem:[%s1555_s3 + $0x18] sm:$0xff]   ;;  %v1209_v40 = vld [vmem:[#allocation2 + $0xe4] ss:$8 sps:$4 sm:$0xff]   ;;  %v1211_v42 = vld [vmem:[#allocation2 + $0xe0] ss:$8 sps:$4 sm:$0xff]  }
  0x34   :  { %416 = vmatpush1.bf16.msra.mxu0 %v1178_v7  ;;  %1104 = vmatpush3.bf16.msra.mxu1 %v1252_v28  ;;  %v1259_v41 = vld [vmem:[%s1555_s3 + $0x68] sm:$0xff]   ;;  %v1212_v44 = vld [vmem:[#allocation2 + $0xf4] ss:$8 sps:$4 sm:$0xff]   ;;  %v1214_v45 = vld [vmem:[#allocation2 + $0xf0] ss:$8 sps:$4 sm:$0xff]  }
  0x35   :  { %417 = vmatprep.subr.bf16.mxu0 %v1179_v8  ;;  %1105 = vmatprep.subr.bf16.mxu1 %v1253_v29  ;;  %v1260_v43 = vld [vmem:[%s1555_s3 + $0x28] sm:$0xff]   ;;  %v1222_v51 = vld [vmem:[#allocation2 + $0x114] ss:$8 sps:$4 sm:$0xff]   ;;  %v1220_v52 = vld [vmem:[#allocation2 + $0x110] ss:$8 sps:$4 sm:$0xff]  }
  0x36   :  { %v1219_v46 = vld [vmem:[#allocation2 + $0x104] ss:$8 sps:$4 sm:$0xff]   ;;  %v1217_v49 = vld [vmem:[#allocation2 + $0x100] ss:$8 sps:$4 sm:$0xff]   ;;  %v1228_v55 = vld [vmem:[#allocation2 + $0x134] ss:$8 sps:$4 sm:$0xff]  }
  0x37   :  { %v62_v47 = vld [vmem:[%s1552_s0 + $0x8] sm:$0xff]  ;;  %v1226_v56 = vld [vmem:[#allocation2 + $0x130] ss:$8 sps:$4 sm:$0xff]   ;;  %v1234_v59 = vld [vmem:[#allocation2 + $0x154] ss:$8 sps:$4 sm:$0xff]  }
  0x38   :  { %418 = vmatpush1.bf16.msra.mxu0 %v1181_v9  ;;  %1106 = vmatpush3.bf16.msra.mxu1 %v1254_v32  ;;  %v1002_v50 = vcombine.high %v62_v47, %v62_v47  ;;  %v1225_v53 = vld [vmem:[#allocation2 + $0x124] ss:$8 sps:$4 sm:$0xff]   ;;  %v1223_v54 = vld [vmem:[#allocation2 + $0x120] ss:$8 sps:$4 sm:$0xff]   ;;  %v1232_v60 = vld [vmem:[#allocation2 + $0x150] ss:$8 sps:$4 sm:$0xff]   ;;  %v1001_v6 = vcombine.low %v62_v47, %v62_v47 }
  0x39   :  { %419 = vmatprep.subr.bf16.mxu0 %v1182_v10  ;;  %1107 = vmatprep.subr.bf16.mxu1 %v1255_v33  ;;  %v1231_v57 = vld [vmem:[#allocation2 + $0x144] ss:$8 sps:$4 sm:$0xff]   ;;  %v1229_v58 = vld [vmem:[#allocation2 + $0x140] ss:$8 sps:$4 sm:$0xff]   ;;  %v1240_v63 = vld [vmem:[#allocation2 + $0x174] ss:$8 sps:$4 sm:$0xff]  }
  0x3a   :  { %v1237_v61 = vld [vmem:[#allocation2 + $0x164] ss:$8 sps:$4 sm:$0xff]   ;;  %v1235_v62 = vld [vmem:[#allocation2 + $0x160] ss:$8 sps:$4 sm:$0xff]   ;;  %v1238_v0 = vld [vmem:[#allocation2 + $0x170] ss:$8 sps:$4 sm:$0xff]  }
  0x3b   :  { %v1243_v1 = vld [vmem:[#allocation2 + $0x184] ss:$8 sps:$4 sm:$0xff]   ;;  %v1241_v2 = vld [vmem:[#allocation2 + $0x180] ss:$8 sps:$4 sm:$0xff]   ;;  %v1261_v7 = vld [vmem:[%s1555_s3 + $0x70] sm:$0xff]  }
  0x3c   :  { %420 = vmatpush1.bf16.msra.mxu0 %v1184_v11  ;;  %1108 = vmatpush3.bf16.msra.mxu1 %v1256_v36  ;;  %v1244_v3 = vld [vmem:[#allocation2 + $0x194] ss:$8 sps:$4 sm:$0x3f]   ;;  %v1246_v4 = vld [vmem:[#allocation2 + $0x190] ss:$8 sps:$4 sm:$0x3f]  }
  0x3d   :  { %421 = vmatprep.subr.bf16.mxu0 %v1185_v12  ;;  %1109 = vmatprep.subr.bf16.mxu1 %v1257_v37  ;;  %v404_v5 = vsel %vm402_vm1, %v1246_v4, 0  ;;  %v1262_v8 = vld [vmem:[%s1555_s3 + $0x30] sm:$0xff]   ;;  %v1263_v9 = vld [vmem:[%s1555_s3 + $0x78] sm:$0xff]   ;;  %v1351_v11 = vmov 0.0   ;;  %v117_v12 = vlaneseq  ;;  %v1265_v28 = vld [vmem:[%s1557_s5] sm:$0xff]  }
  0x3e   :  { %v1264_v10 = vld [vmem:[%s1555_s3 + $0x38] sm:$0xff]   ;;  %v1269_v33 = vld [vmem:[%s1557_s5 + $0x20] sm:$0xff]  }
  0x3f   :  { %v1488_v13 = vshrl.u32 %v117_v12, 7  ;;  %v1268_v32 = vld [vmem:[%s1557_s5 + $0x18] sm:$0xff]   ;;  %v1275_v37 = vld [vmem:[#allocation4 + $0x4] ss:$16 sps:$4 sm:$0xff]  }
  0x40   :  { %422 = vmatpush1.bf16.msra.mxu0 %v1187_v15  ;;  %1110 = vmatpush3.bf16.msra.mxu1 %v1258_v39  ;;  %v115_v15 = vld [vmem:[%s1554_s2] sm:$0x3]  ;;  %v1272_v36 = vld [vmem:[%s1557_s5 + $0x38] sm:$0xff]  }
  0x41   :  { %423 = vmatprep.subr.bf16.mxu0 %v1188_v16  ;;  %1111 = vmatprep.subr.bf16.mxu1 %v1259_v41  ;;  %v119_v14 = vsub.s32 0, %v1488_v13  ;;  %v123_v16 = vsub.s32 1, %v1488_v13  ;;  %v1057_v39 = vld [vmem:[%s1556_s4] ss:$0 sm:$0xff]  ;;  %v1291_v4 = vld [vmem:[#allocation4 + $0x48] ss:$16 sps:$4 sm:$0xff]  }
  0x44   :  { %424 = vmatpush1.bf16.msra.mxu0 %v1190_v17  ;;  %1112 = vmatpush3.bf16.msra.mxu1 %v1260_v43  ;;  %v120_v17 = vrot.slane %v115_v15, %v119_v14 }
  0x45   :  { %425 = vmatprep.subr.bf16.mxu0 %v1191_v18  ;;  %1113 = vmatprep.subr.bf16.mxu1 %v1261_v7  ;;  %v124_v18 = vrot.slane %v115_v15, %v123_v16  ;;  %v801_v7 = vld [vmem:[%s1560_s8] sm:$0xf] }
  0x48   :  { %426 = vmatpush1.bf16.msra.mxu0 %v1193_v19  ;;  %1114 = vmatpush3.bf16.msra.mxu1 %v1262_v8  ;;  %v806_v8 = vrot.slane %v801_v7, %v119_v14  ;;  %v817_v14 = vsub.s32 3, %v1488_v13 }
  0x49   :  { %427 = vmatprep.subr.bf16.mxu0 %v1194_v20  ;;  %1115 = vmatprep.subr.bf16.mxu1 %v1263_v9  ;;  %v810_v9 = vrot.slane %v801_v7, %v123_v16 }
  0x4a   :  { %v818_v16 = vrot.slane %v801_v7, %v817_v14 }
  0x4c   :  { %428 = vmatpush1.bf16.msra.mxu0 %v1196_v21  ;;  %1116 = vmatpush3.bf16.msra.mxu1 %v1264_v10 }
  0x4d   :  { %429 = vmatprep.subr.bf16.mxu0 %v1197_v22  ;;  %1132 = vmatprep.subr.bf16.mxu1 %v1351_v11 }
  0x50   :  { %430 = vmatpush1.bf16.msra.mxu0 %v1199_v24 }
  0x51   :  { %431 = vmatprep.subr.bf16.mxu0 %v1200_v26 }
  0x54   :  { %432 = vmatpush1.bf16.msra.mxu0 %v1202_v30  ;;  %v1266_v30 = vld [vmem:[%s1557_s5 + $0x8] sm:$0xff]  }
  0x55   :  { %433 = vmatprep.subr.bf16.mxu0 %v1203_v31  ;;  %v1267_v31 = vld [vmem:[%s1557_s5 + $0x10] sm:$0xff]  }
  0x58   :  { %434 = vmatpush1.bf16.msra.mxu0 %v1205_v34  ;;  %v1270_v34 = vld [vmem:[%s1557_s5 + $0x28] sm:$0xff]  }
  0x59   :  { %435 = vmatprep.subr.bf16.mxu0 %v1206_v35  ;;  %v1271_v35 = vld [vmem:[%s1557_s5 + $0x30] sm:$0xff]  }
  0x5c   :  { %436 = vmatpush1.bf16.msra.mxu0 %v1208_v38 }
  0x5d   :  { %437 = vmatprep.subr.bf16.mxu0 %v1209_v40 }
  0x60   :  { %438 = vmatpush1.bf16.msra.mxu0 %v1211_v42 }
  0x61   :  { %439 = vmatprep.subr.bf16.mxu0 %v1212_v44 }
  0x64   :  { %440 = vmatpush1.bf16.msra.mxu0 %v1214_v45 }
  0x65   :  { %450 = vmatprep.subr.bf16.mxu0 %v1219_v46  ;;  %v1273_v46 = vld [vmem:[#allocation4] ss:$16 sps:$4 sm:$0xff]  }
  0x67   :  { %442 = vmatmul.mubr.bf16.vlgmr.msra.gmra.mrb[0].mxu0 %v999_v48  ;;  %v1278_v48 = vld [vmem:[#allocation4 + $0x24] ss:$16 sps:$4 sm:$0xff]  }
  0x68   :  { %451 = vmatpush1.bf16.msra.mxu0 %v1217_v49  ;;  %1056 = vmatprep.mubr.msk.bf16.mxu0 %vm398_vm0, %v1002_v50  ;;  %v1276_v49 = vld [vmem:[#allocation4 + $0x20] ss:$16 sps:$4 sm:$0xff]   ;;  %v1281_v50 = vld [vmem:[#allocation4 + $0x44] ss:$16 sps:$4 sm:$0xff]  }
  0x69   :  { %452 = vmatprep.subr.bf16.mxu0 %v1222_v51  ;;  %v1279_v51 = vld [vmem:[#allocation4 + $0x40] ss:$16 sps:$4 sm:$0xff]  }
  0x6c   :  { %453 = vmatpush1.bf16.msra.mxu0 %v1220_v52  ;;  %v1284_v52 = vld [vmem:[#allocation4 + $0x64] ss:$16 sps:$4 sm:$0xff]  }
  0x6d   :  { %454 = vmatprep.subr.bf16.mxu0 %v1225_v53  ;;  %v1282_v53 = vld [vmem:[#allocation4 + $0x60] ss:$16 sps:$4 sm:$0xff]  }
  0x70   :  { %455 = vmatpush1.bf16.msra.mxu0 %v1223_v54  ;;  %v1287_v54 = vld [vmem:[#allocation4 + $0xc] ss:$16 sps:$4 sm:$0xff]  }
  0x71   :  { %456 = vmatprep.subr.bf16.mxu0 %v1228_v55  ;;  %v1353_v55 = vmov 0  }
  0x74   :  { %457 = vmatpush1.bf16.msra.mxu0 %v1226_v56  ;;  %v1074_v56 = vld [vmem:[%s1558_s6] ss:$0 sm:$0xff] }
  0x75   :  { %458 = vmatprep.subr.bf16.mxu0 %v1231_v57 }
  0x78   :  { %459 = vmatpush1.bf16.msra.mxu0 %v1229_v58 }
  0x79   :  { %460 = vmatprep.subr.bf16.mxu0 %v1234_v59 }
  0x7c   :  { %461 = vmatpush1.bf16.msra.mxu0 %v1232_v60 }
  0x7d   :  { %462 = vmatprep.subr.bf16.mxu0 %v1237_v61 }
  0x80   :  { %463 = vmatpush1.bf16.msra.mxu0 %v1235_v62 }
  0x81   :  { %464 = vmatprep.subr.bf16.mxu0 %v1240_v63  ;;  %v1285_v63 = vld [vmem:[#allocation4 + $0x8] ss:$16 sps:$4 sm:$0xff]  }
  0x84   :  { %465 = vmatpush1.bf16.msra.mxu0 %v1238_v0 }
  0x85   :  { %466 = vmatprep.subr.bf16.mxu0 %v1243_v1  ;;  %v1290_v1 = vld [vmem:[#allocation4 + $0x2c] ss:$16 sps:$4 sm:$0xff]  }
  0x88   :  { %467 = vmatpush1.bf16.msra.mxu0 %v1241_v2  ;;  %v1288_v2 = vld [vmem:[#allocation4 + $0x28] ss:$16 sps:$4 sm:$0xff]  }
  0x89   :  { %1055 = vmatprep.subr.msk.bf16.mxu0 %vm402_vm1, %v1244_v3  ;;  %v1293_v3 = vld [vmem:[#allocation4 + $0x4c] ss:$16 sps:$4 sm:$0xff]  }
  0x8c   :  { %469 = vmatpush1.bf16.msra.mxu0 %v404_v5  ;;  %v1296_v5 = vld [vmem:[#allocation4 + $0x6c] ss:$16 sps:$4 sm:$0xff]  }
  0x8f   :  { %483 = vmatmul.mubr.bf16.vlgmr.msra.gmra.mrb[0].mxu0 %v1001_v6  ;;  %v1294_v6 = vld [vmem:[#allocation4 + $0x68] ss:$16 sps:$4 sm:$0xff]  }
 0x162   :  { %v484_v19 = vpop.f32.mrb[0].mxu0 }
 0x163   :  { %v1152_v20 = vadd.f32 %v484_v19, %v120_v17  ;;  %v486_v21 = vpop.f32.mrb[1].mxu0  ;;  %v813_v19 = vsub.s32 2, %v1488_v13 }
 0x164   :  { %v1153_v22 = vadd.f32 %v486_v21, %v124_v18  ;;  %v488_v23 = vpop.f32.mrb[2].mxu0 }
 0x165   :  { %v491_v24 = vmax.f32 %v1152_v20, 0.0  ;;  %v489_v25 = vpop.f32.mrb[3].mxu0  ;;  %v814_v20 = vrot.slane %v801_v7, %v813_v19 }
 0x166   :  { %v492_v26 = vmax.f32 %v1153_v22, 0.0 }
 0x167   :  { %v493_v29 = vpack.c.bf16 %v491_v24, %v491_v24 }
 0x168   :  { %v494_v27 = vpack.c.bf16 %v492_v26, %v492_v26 }
 0x16a   :  { %662 = vmatprep.mubr.bf16.mxu1 %v494_v27 }
 0x16b   :  { %663 = vmatmul.mubr.bf16.vlgmr.msra.gmra.mrb[0].mxu1 %v493_v29 }
 0x16c   :  { %1133 = vmatpush3.bf16.msra.mxu1 %v1265_v28  ;;  %1148 = vmatprep.mubr.msk.bf16.mxu1 %vm1352_vm2, %v1351_v11 }
 0x16d   :  { %1134 = vmatprep.subr.bf16.mxu1 %v1351_v11 }
 0x170   :  { %1135 = vmatpush3.bf16.msra.mxu1 %v1266_v30 }
 0x171   :  { %1136 = vmatprep.subr.bf16.mxu1 %v1351_v11 }
 0x174   :  { %1137 = vmatpush3.bf16.msra.mxu1 %v1267_v31 }
 0x175   :  { %1138 = vmatprep.subr.bf16.mxu1 %v1351_v11 }
 0x178   :  { %1139 = vmatpush3.bf16.msra.mxu1 %v1268_v32 }
 0x179   :  { %1140 = vmatprep.subr.bf16.mxu1 %v1351_v11 }
 0x17c   :  { %1141 = vmatpush3.bf16.msra.mxu1 %v1269_v33 }
 0x17d   :  { %1142 = vmatprep.subr.bf16.mxu1 %v1351_v11 }
 0x180   :  { %1143 = vmatpush3.bf16.msra.mxu1 %v1270_v34 }
 0x181   :  { %1144 = vmatprep.subr.bf16.mxu1 %v1351_v11 }
 0x184   :  { %1145 = vmatpush3.bf16.msra.mxu1 %v1271_v35 }
 0x185   :  { %1146 = vmatprep.subr.bf16.mxu1 %v1351_v11 }
 0x188   :  { %1147 = vmatpush3.bf16.msra.mxu1 %v1272_v36 }
 0x189   :  { %907 = vmatprep.subr.bf16.mxu1 %v1275_v37 }
 0x23e   :  { %v1117_v38 = vpop.f32.mrb[0].mxu1 }
 0x23f   :  { %v1118_v40 = vpop.f32.mrb[1].mxu1 }
 0x240   :  { %v1119_v41 = vadd.f32 %v1118_v40, %v1117_v38  ;;  %v1120_v42 = vpop.f32.mrb[2].mxu1 }
 0x241   :  { %v1121_v43 = vpop.f32.mrb[3].mxu1 }
 0x242   :  { %v665_v44 = vadd.f32 %v1119_v41, %v1057_v39 }
 0x244   :  { %v670_v45 = vmax.f32 %v665_v44, 0.0 }
 0x246   :  { %v671_v47 = vpack.c.bf16 %v670_v45, %v670_v45 }
 0x248   :  { %1149 = vmatmul.mubr.bf16.vlgmr.msra.gmra.mrb[4].mxu1 %v671_v47 }
 0x249   :  { %908 = vmatpush1.bf16.msra.mxu1 %v1273_v46  ;;  %939 = vmatprep.mubr.bf16.mxu1 %v1353_v55 }
 0x24a   :  { %909 = vmatprep.subr.bf16.mxu1 %v1278_v48 }
 0x24d   :  { %910 = vmatpush1.bf16.msra.mxu1 %v1276_v49 }
 0x24e   :  { %911 = vmatprep.subr.bf16.mxu1 %v1281_v50 }
 0x251   :  { %912 = vmatpush1.bf16.msra.mxu1 %v1279_v51 }
 0x252   :  { %913 = vmatprep.subr.bf16.mxu1 %v1284_v52 }
 0x255   :  { %914 = vmatpush1.bf16.msra.mxu1 %v1282_v53 }
 0x256   :  { %948 = vmatprep.subr.bf16.mxu1 %v1287_v54 }
 0x31b   :  { %v777_v57 = vpop.f32.mrb[4].mxu1 }
 0x31c   :  { %v778_v58 = vadd.f32 %v1074_v56, %v777_v57  ;;  %v1150_v59 = vpop.f32.mrb[5].mxu1 }
 0x31d   :  { %v780_v60 = vpop.f32.mrb[6].mxu1 }
 0x31e   :  { %v783_v61 = vmax.f32 %v778_v58, 0.0  ;;  %v1151_v62 = vpop.f32.mrb[7].mxu1 }
 0x320   :  { %v784_v0 = vpack.c.bf16 %v783_v61, %v783_v61 }
 0x322   :  { %1099 = vmatmul.mubr.msk.bf16.vlgmr.msra.gmra.mrb[8].mxu1 %vm903_vm3, %v784_v0 }
 0x323   :  { %949 = vmatpush1.bf16.msra.mxu1 %v1285_v63  ;;  %980 = vmatprep.mubr.bf16.mxu1 %v1353_v55 }
 0x324   :  { %950 = vmatprep.subr.bf16.mxu1 %v1290_v1 }
 0x327   :  { %951 = vmatpush1.bf16.msra.mxu1 %v1288_v2 }
 0x328   :  { %952 = vmatprep.subr.bf16.mxu1 %v1293_v3 }
 0x32b   :  { %953 = vmatpush1.bf16.msra.mxu1 %v1291_v4 }
 0x32c   :  { %954 = vmatprep.subr.bf16.mxu1 %v1296_v5 }
 0x32f   :  { %955 = vmatpush1.bf16.msra.mxu1 %v1294_v6 }
 0x332   :  { %1100 = vmatmul.mubr.msk.bf16.vlgmr.msra.gmra.mrb[12].mxu1 %vm903_vm3, %v784_v0 }
 0x3f5   :  { %v941_v10 = vpop.f32.mrb[8].mxu1 }
 0x3f6   :  { %v942_v11 = vadd.f32 %v941_v10, %v806_v8  ;;  %v943_v12 = vpop.f32.mrb[9].mxu1 }
 0x3f7   :  { %v944_v15 = vadd.f32 %v943_v12, %v810_v9  ;;  %v945_v17 = vpop.f32.mrb[10].mxu1 }
 0x3f8   :  { %989 = vst [vmem:[%s1561_s9] sm:$0xff] %v942_v11  ;;  %v946_v18 = vpop.f32.mrb[11].mxu1 }
 0x3f9   :  { %990 = vst [vmem:[%s1561_s9 + $0x8] sm:$0xff] %v944_v15 }
 0x405   :  { %v982_v21 = vpop.f32.mrb[12].mxu1 }
 0x406   :  { %v983_v22 = vadd.f32 %v982_v21, %v814_v20  ;;  %v984_v23 = vpop.f32.mrb[13].mxu1 }
 0x407   :  { %v985_v24 = vadd.f32 %v984_v23, %v818_v16  ;;  %v986_v25 = vpop.f32.mrb[14].mxu1 }
 0x408   :  { %991 = vst [vmem:[%s1561_s9 + $0x10] sm:$0xff] %v983_v22  ;;  %v987_v26 = vpop.f32.mrb[15].mxu1 }
 0x409   :  { %992 = vst [vmem:[%s1561_s9 + $0x18] sm:$0xff] %v985_v24 }
 0x40a   :  { %997 = vsyncpa [#allocation3], 1 }
 0x40b   :  { %998 = vsyncpa [#allocation5], 1 }

</bundles_post_ra>
